<compile_context>
chip_gen: v7x
topology: tpu7x:2x2x1
jax: 0.10.0
libtpu: 0.0.40
codegen_flags: <defaults>
</compile_context>

<pallas_src>
import functools
import math

import jax
import jax.numpy as jnp
from jax import lax
from jax.experimental import pallas as pl
from jax.experimental.pallas import tpu as pltpu


def _attend_accumulate(qh, kh, xv, wh, acc_ref, scale):
    """acc += softmax(q_h k_h^T * scale) @ x @ W_h  for one head / one query tile."""
    # Fold the 1/sqrt(hs) scale into the (Tq, HS) query tile instead of the
    # (Tq, T) f32 score block (fewer VPU multiplies, same math).
    qh = qh * jnp.asarray(scale, dtype=qh.dtype)
    scores = lax.dot_general(
        qh, kh, (((1,), (1,)), ((), ())),
        preferred_element_type=jnp.float32,
    )                                                           # (Tq, T) f32
    scores = scores - jnp.max(scores, axis=-1, keepdims=True)
    p = jnp.exp(scores)
    denom = jnp.sum(p, axis=-1, keepdims=True)                  # (Tq, 1) f32
    out_h = jnp.dot(p.astype(xv.dtype), xv,
                    preferred_element_type=jnp.float32)         # (Tq, E) f32
    # Deferred softmax normalization on (Tq, E) rather than (Tq, T); EXACT
    # reciprocal (approx EUP reciprocal is only ~1e-2 accurate -> failed check).
    out_h = out_h * pl.reciprocal(denom, approx=False)
    acc_ref[...] += jnp.dot(out_h.astype(wh.dtype), wh,
                            preferred_element_type=jnp.float32)  # (Tq, E) f32


def _kernel_lane_dense_k(k_ref, x_ref, w_ref, o_ref, acc_ref, *,
                         scale, tq, weight_resident):
    # k_ref:   (1, 1, T, HS)  lane-dense keys for this (batch, head); q is rows of k
    # x_ref:   (1, T, E)      values == raw embedding (resident per batch)
    # w_ref:   (NH, E, E) if weight_resident else (1, E, E)
    # o_ref:   (1, Tq, E)     output tile (resident across the head axis)
    # acc_ref: (Tq, E) f32    accumulator scratch
    h = pl.program_id(2)

    @pl.when(h == 0)
    def _init():
        acc_ref[...] = jnp.zeros_like(acc_ref)

    q_start = pl.multiple_of(pl.program_id(1) * tq, tq)
    qh = k_ref[0, 0, pl.ds(q_start, tq), :]      # (Tq, HS): q tile = rows of k
    kh = k_ref[0, 0]                             # (T,  HS)
    xv = x_ref[0]                                # (T,  E)
    wh = w_ref[h] if weight_resident else w_ref[0]

    _attend_accumulate(qh, kh, xv, wh, acc_ref, scale)

    @pl.when(h == pl.num_programs(2) - 1)
    def _write():
        o_ref[0] = acc_ref[...].astype(o_ref.dtype)


def _kernel_qk_from_x(x_ref, w_ref, o_ref, acc_ref, *,
                      scale, tq, head_size, weight_resident):
    # head_size % 128 == 0: q and k are clean lane slices of the resident x block,
    # so no separate (B, NH, T, HS) operand (nor a wrapper transpose) is needed.
    h = pl.program_id(2)

    @pl.when(h == 0)
    def _init():
        acc_ref[...] = jnp.zeros_like(acc_ref)

    col = pl.multiple_of(h * head_size, head_size)
    q_start = pl.multiple_of(pl.program_id(1) * tq, tq)
    kh = x_ref[0, :, pl.ds(col, head_size)]                       # (T,  HS)
    qh = x_ref[0, pl.ds(q_start, tq), pl.ds(col, head_size)]      # (Tq, HS)
    xv = x_ref[0]                                                 # (T,  E)
    wh = w_ref[h] if weight_resident else w_ref[0]

    _attend_accumulate(qh, kh, xv, wh, acc_ref, scale)

    @pl.when(h == pl.num_programs(2) - 1)
    def _write():
        o_ref[0] = acc_ref[...].astype(o_ref.dtype)


def _pick_query_tile(t):
    """MXU-friendly query tile that bounds the (Tq, T) f32 score block."""
    if t % 128 == 0:
        # Cap at 128 for long sequences so the f32 softmax temporaries stay small
        # (matters most on v7x's 64 MiB VMEM); shorter sequences can use 256.
        return 256 if (t % 256 == 0 and t < 2048) else 128
    if t <= 256:
        return t          # tiny / ragged T: one tile == full array dims (legal)
    # Ragged larger T: largest multiple-of-8 divisor <= 256 keeps the output block
    # legal under the (8, 128) rule and bounds the score block.
    for c in range(256, 7, -8):
        if t % c == 0:
            return c
    # TODO(synk): pad T to a multiple of 128 + mask for large ragged T with no
    # usable divisor instead of falling back to a full-length tile.
    return t


def _maybe_single_buffer(nbytes):
    # Single-buffer large resident blocks (their block index rarely/never changes);
    # tiny blocks keep the default pipelining (double buffering them is harmless).
    return pl.Buffered(1) if nbytes >= (512 << 10) else None


def shard_attention(x, weight, num_heads):
    """x: (B, T, E), weight: (num_heads * E, E) -> (B, T, E)."""
    b, t, e = x.shape
    assert e % num_heads == 0, "num_heads must divide the embedding size"
    head_size = e // num_heads
    assert weight.shape == (num_heads * e, e)

    w_heads = weight.reshape(num_heads, e, e)       # head-major (NH, E, E) slabs
    tq = _pick_query_tile(t)
    n_qt = t // tq
    scale = 1.0 / math.sqrt(head_size)

    # Lane-aligned heads: derive q/k from the resident x block; otherwise build a
    # lane-dense (B, NH, T, HS) key layout once in the wrapper.
    derive_qk_from_x = (head_size % 128 == 0)

    itemsize = jnp.dtype(x.dtype).itemsize
    w_itemsize = jnp.dtype(weight.dtype).itemsize

    x_block_bytes = t * e * itemsize
    k_block_bytes = t * head_size * itemsize
    w_resident_bytes = num_heads * e * e * w_itemsize

    x_mode = _maybe_single_buffer(x_block_bytes)
    w_mode = _maybe_single_buffer(w_resident_bytes)

    # --- VMEM budget (double-buffering counted explicitly, no extra 2x slack). ---
    est = (1 if x_mode is not None else 2) * x_block_bytes        # values block
    if not derive_qk_from_x:
        est += 2 * k_block_bytes                                  # per-head key block
    est += 2 * tq * e * itemsize                                  # output block
    est += tq * e * 4                                             # f32 accumulator scratch
    est += 3 * tq * t * 4                                         # scores / exp temporaries
    est += 2 * tq * e * 4                                         # head-output temporaries

    try:
        phys_vmem = int(pltpu.get_tpu_info().vmem_capacity_bytes)
    except Exception:  # no TPU visible (e.g. interpret mode) -> be conservative (v7x)
        phys_vmem = 64 << 20
    vmem_cap = int(0.875 * phys_vmem)     # ~56 MiB on v7x, ~112 MiB on v5e/v6e

    # Keep the whole (NH, E, E) weight resident (DMA'd once per kernel call) when it
    # fits the budget; otherwise stream one (E, E) slab per head step.
    weight_resident = est + w_resident_bytes + (4 << 20) <= vmem_cap
    if weight_resident:
        est += (1 if w_mode is not None else 2) * w_resident_bytes
    else:
        est += 2 * e * e * w_itemsize
    vmem_limit = int(min(max(est + (4 << 20), 16 << 20), vmem_cap))

    out_shape = jax.ShapeDtypeStruct((b, t, e), x.dtype)
    x_spec = pl.BlockSpec((1, t, e), lambda bi, qi, hi: (bi, 0, 0),
                          pipeline_mode=x_mode)
    if weight_resident:
        w_spec = pl.BlockSpec((num_heads, e, e), lambda bi, qi, hi: (0, 0, 0),
                              pipeline_mode=w_mode)
    else:
        w_spec = pl.BlockSpec((1, e, e), lambda bi, qi, hi: (hi, 0, 0))
    out_spec = pl.BlockSpec((1, tq, e), lambda bi, qi, hi: (bi, qi, 0))
    scratch = [pltpu.VMEM((tq, e), jnp.float32)]
    compiler_params = pltpu.CompilerParams(
        dimension_semantics=("parallel", "parallel", "arbitrary"),
        vmem_limit_bytes=vmem_limit,
    )

    # TODO(synk): optional `mask` argument of raw_attention is not plumbed (mask=None only).
    # TODO(synk): for very long T, switch the key/value axis to a tiled online (flash-style)
    #             softmax so the working set stops growing linearly with T.
    # TODO(synk): batch >=2 heads per grid step when head_size << 256 to better feed the
    #             256-wide MXUs on v6e/v7x (second-order win).

    if derive_qk_from_x:
        kernel = functools.partial(
            _kernel_qk_from_x, scale=scale, tq=tq, head_size=head_size,
            weight_resident=weight_resident)
        grid_spec = pltpu.PrefetchScalarGridSpec(
            num_scalar_prefetch=0, grid=(b, n_qt, num_heads),
            in_specs=[x_spec, w_spec], out_specs=out_spec,
            scratch_shapes=scratch)
        return pl.pallas_call(kernel, out_shape=out_shape, grid_spec=grid_spec,
                              compiler_params=compiler_params)(x, w_heads)

    # Lane-dense per-head key layout (layout plumbing done once here, not per step).
    k_heads = x.reshape(b, t, num_heads, head_size).transpose(0, 2, 1, 3)  # (B, NH, T, HS)
    k_spec = pl.BlockSpec((1, 1, t, head_size), lambda bi, qi, hi: (bi, hi, 0, 0))
    kernel = functools.partial(
        _kernel_lane_dense_k, scale=scale, tq=tq, weight_resident=weight_resident)
    grid_spec = pltpu.PrefetchScalarGridSpec(
        num_scalar_prefetch=0, grid=(b, n_qt, num_heads),
        in_specs=[k_spec, x_spec, w_spec], out_specs=out_spec,
        scratch_shapes=scratch)
    return pl.pallas_call(kernel, out_shape=out_shape, grid_spec=grid_spec,
                          compiler_params=compiler_params)(k_heads, x, w_heads)


def _reference(x, weight, num_heads):
    b, t, e = x.shape
    hs = e // num_heads
    q = x.reshape(b, t, num_heads, hs).transpose(0, 2, 1, 3)      # (B, NH, T, HS)
    k = q
    v = jnp.broadcast_to(x[:, None, :, :], (b, num_heads, t, e))  # (B, NH, T, E)
    att = jnp.einsum("bhqd,bhkd->bhqk", q, k) / math.sqrt(hs)
    att = jax.nn.softmax(att, axis=-1)
    y = jnp.einsum("bhqk,bhkc->bhqc", att, v)                     # (B, NH, T, E)
    y = y.transpose(0, 2, 1, 3).reshape(b, t, num_heads * e)      # (B, T, NH*E)
    return y @ weight


if __name__ == "__main__":
    B, T, E, NH = 2, 8, 32, 4

    key = jax.random.PRNGKey(0)
    kx, kw = jax.random.split(key)
    x = jax.random.normal(kx, (B, T, E), dtype=jnp.float32)

    # kuni_parameter(num_heads*embed_size, embed_size): kaiming-uniform style init,
    # generated deterministically in-script (synthetic weights, no checkpoint load).
    fan_in = NH * E
    bound = math.sqrt(6.0 / fan_in)
    weight = jax.random.uniform(kw, (NH * E, E), dtype=jnp.float32,
                                minval=-bound, maxval=bound)

    y = shard_attention(x, weight, NH)
    y = jax.block_until_ready(y)

    y_ref = _reference(x, weight, NH)
    err = float(jnp.max(jnp.abs(y - y_ref)))
    assert jnp.allclose(y, y_ref, atol=1e-3, rtol=1e-3), err

    print("KERNEL_OK")
</pallas_src>

<mosaic_0001>
module attributes {stable_mosaic.version = 11 : i64} {
  func.func @_kernel_lane_dense_k(%arg0: i32, %arg1: i32, %arg2: i32, %arg3: memref<1x1x8x8xf32, #tpu.memory_space<vmem>>, %arg4: memref<1x8x32xf32, #tpu.memory_space<vmem>>, %arg5: memref<4x32x32xf32, #tpu.memory_space<vmem>>, %arg6: memref<1x8x32xf32, #tpu.memory_space<vmem>>, %arg7: memref<8x32xf32, #tpu.memory_space<vmem>>) attributes {dimension_semantics = [#tpu.dimension_semantics<parallel>, #tpu.dimension_semantics<parallel>, #tpu.dimension_semantics<arbitrary>], iteration_bounds = array<i64: 2, 1, 4>, scalar_prefetch = 0 : i64, scratch_operands = 1 : i64, tpu.core_type = #tpu.core_type<tc>, window_params = [{transform_indices = @transform_0, window_bounds = array<i64: 1, 1, 8, 8>}, {transform_indices = @transform_1, window_bounds = array<i64: 1, 8, 32>}, {pipeline_mode = #tpu.pipeline_mode<synchronous>, transform_indices = @transform_2, window_bounds = array<i64: 4, 32, 32>}, {transform_indices = @transform_3, window_bounds = array<i64: 1, 8, 32>}]} {
    %c0_i32 = arith.constant 0 : i32
    %0 = arith.cmpi eq, %arg2, %c0_i32 : i32
    %1 = arith.extui %0 : i1 to i32
    %c0_i32_0 = arith.constant 0 : i32
    %2 = arith.cmpi ne, %1, %c0_i32_0 : i32
    scf.if %2 {
      %cst_22 = arith.constant 0.000000e+00 : f32
      %36 = vector.broadcast %cst_22 : f32 to vector<8x32xf32>
      %c0_23 = arith.constant 0 : index
      %c0_24 = arith.constant 0 : index
      %37 = vector.load %arg7[%c0_23, %c0_24] : memref<8x32xf32, #tpu.memory_space<vmem>>, vector<8x32xf32>
      tpu.vector_store %arg7[%c0_23, %c0_24], %36 {strides = array<i32>} : memref<8x32xf32, #tpu.memory_space<vmem>>, vector<8x32xf32>,
    } else {
    }
    %c8_i32 = arith.constant 8 : i32
    %3 = arith.muli %arg1, %c8_i32 : i32
    %4 = tpu.assume_multiple %3, 8 : i32
    %c0 = arith.constant 0 : index
    %c0_1 = arith.constant 0 : index
    %5 = arith.index_cast %4 : i32 to index
    %c0_2 = arith.constant 0 : index
    %6 = vector.load %arg3[%c0, %c0_1, %5, %c0_2] : memref<1x1x8x8xf32, #tpu.memory_space<vmem>>, vector<1x1x8x8xf32>
    %7 = vector.shape_cast %6 : vector<1x1x8x8xf32> to vector<8x8xf32>
    %c0_3 = arith.constant 0 : index
    %c0_4 = arith.constant 0 : index
    %c0_5 = arith.constant 0 : index
    %c0_6 = arith.constant 0 : index
    %8 = vector.load %arg3[%c0_3, %c0_4, %c0_5, %c0_6] : memref<1x1x8x8xf32, #tpu.memory_space<vmem>>, vector<1x1x8x8xf32>
    %9 = vector.shape_cast %8 : vector<1x1x8x8xf32> to vector<8x8xf32>
    %c0_7 = arith.constant 0 : index
    %c0_8 = arith.constant 0 : index
    %c0_9 = arith.constant 0 : index
    %10 = vector.load %arg4[%c0_7, %c0_8, %c0_9] : memref<1x8x32xf32, #tpu.memory_space<vmem>>, vector<1x8x32xf32>
    %11 = vector.shape_cast %10 : vector<1x8x32xf32> to vector<8x32xf32>
    %12 = arith.index_cast %arg2 : i32 to index
    %c0_10 = arith.constant 0 : index
    %c0_11 = arith.constant 0 : index
    %13 = vector.load %arg5[%12, %c0_10, %c0_11] : memref<4x32x32xf32, #tpu.memory_space<vmem>>, vector<1x32x32xf32>
    %14 = vector.shape_cast %13 : vector<1x32x32xf32> to vector<32x32xf32>
    %cst = arith.constant 0.353553385 : f32
    %15 = vector.broadcast %cst : f32 to vector<8x8xf32>
    %16 = arith.mulf %7, %15 : vector<8x8xf32>
    %cst_12 = arith.constant dense<0.000000e+00> : vector<8x8xf32>
    %17 = tpu.matmul %16, %9, %cst_12 {dimension_numbers = #tpu.dot_dimension_numbers<[1], [1], [0], [0], [0, 0, 1, 0], [], []>} : vector<8x8xf32>, vector<8x8xf32>, vector<8x8xf32> -> vector<8x8xf32>
    %cst_13 = arith.constant dense<0xFF800000> : vector<8xf32>
    %18 = vector.multi_reduction <maximumf>, %17, %cst_13 [1] : vector<8x8xf32> to vector<8xf32>
    %19 = vector.shape_cast %18 : vector<8xf32> to vector<8x1xf32>
    %20 = vector.broadcast %19 : vector<8x1xf32> to vector<8x8xf32>
    %21 = arith.subf %17, %20 : vector<8x8xf32>
    %22 = math.exp %21 : vector<8x8xf32>
    %cst_14 = arith.constant dense<0.000000e+00> : vector<8xf32>
    %23 = vector.multi_reduction <add>, %22, %cst_14 [1] : vector<8x8xf32> to vector<8xf32>
    %24 = vector.shape_cast %23 : vector<8xf32> to vector<8x1xf32>
    %cst_15 = arith.constant dense<0.000000e+00> : vector<8x32xf32>
    %25 = tpu.matmul %22, %11, %cst_15 {dimension_numbers = #tpu.dot_dimension_numbers<[1], [0], [0], [1], [0, 0, 1, 1], [], []>} : vector<8x8xf32>, vector<8x32xf32>, vector<8x32xf32> -> vector<8x32xf32>
    %26 = tpu.reciprocal %24 : vector<8x1xf32> -> vector<8x1xf32>
    %27 = vector.broadcast %26 : vector<8x1xf32> to vector<8x32xf32>
    %28 = arith.mulf %25, %27 : vector<8x32xf32>
    %c0_16 = arith.constant 0 : index
    %c0_17 = arith.constant 0 : index
    %29 = vector.load %arg7[%c0_16, %c0_17] : memref<8x32xf32, #tpu.memory_space<vmem>>, vector<8x32xf32>
    %cst_18 = arith.constant dense<0.000000e+00> : vector<8x32xf32>
    %30 = tpu.matmul %28, %14, %cst_18 {dimension_numbers = #tpu.dot_dimension_numbers<[1], [0], [0], [1], [0, 0, 1, 1], [], []>} : vector<8x32xf32>, vector<32x32xf32>, vector<8x32xf32> -> vector<8x32xf32>
    %31 = arith.addf %29, %30 : vector<8x32xf32>
    %c0_19 = arith.constant 0 : index
    %c0_20 = arith.constant 0 : index
    %32 = vector.load %arg7[%c0_19, %c0_20] : memref<8x32xf32, #tpu.memory_space<vmem>>, vector<8x32xf32>
    tpu.vector_store %arg7[%c0_19, %c0_20], %31 {strides = array<i32>} : memref<8x32xf32, #tpu.memory_space<vmem>>, vector<8x32xf32>,
    %c3_i32 = arith.constant 3 : i32
    %33 = arith.cmpi eq, %arg2, %c3_i32 : i32
    %34 = arith.extui %33 : i1 to i32
    %c0_i32_21 = arith.constant 0 : i32
    %35 = arith.cmpi ne, %34, %c0_i32_21 : i32
    scf.if %35 {
      %c0_22 = arith.constant 0 : index
      %c0_23 = arith.constant 0 : index
      %36 = vector.load %arg7[%c0_22, %c0_23] : memref<8x32xf32, #tpu.memory_space<vmem>>, vector<8x32xf32>
      %c0_24 = arith.constant 0 : index
      %c0_25 = arith.constant 0 : index
      %c0_26 = arith.constant 0 : index
      %37 = vector.load %arg6[%c0_24, %c0_25, %c0_26] : memref<1x8x32xf32, #tpu.memory_space<vmem>>, vector<1x8x32xf32>
      %38 = vector.shape_cast %37 : vector<1x8x32xf32> to vector<8x32xf32>
      %39 = vector.shape_cast %36 : vector<8x32xf32> to vector<1x8x32xf32>
      tpu.vector_store %arg6[%c0_24, %c0_25, %c0_26], %39 {strides = array<i32>} : memref<1x8x32xf32, #tpu.memory_space<vmem>>, vector<1x8x32xf32>,
    } else {
    }
    return
  }
  func.func @transform_0(%arg0: i32, %arg1: i32, %arg2: i32) -> (i32, i32, i32, i32) {
    %c0_i32 = arith.constant 0 : i32
    %c0_i32_0 = arith.constant 0 : i32
    %c0_i32_1 = arith.constant 0 : i32
    return %arg0, %arg2, %c0_i32, %c0_i32_0 : i32, i32, i32, i32
  }
  func.func @transform_1(%arg0: i32, %arg1: i32, %arg2: i32) -> (i32, i32, i32) {
    %c0_i32 = arith.constant 0 : i32
    %c0_i32_0 = arith.constant 0 : i32
    %c0_i32_1 = arith.constant 0 : i32
    return %arg0, %c0_i32, %c0_i32_0 : i32, i32, i32
  }
  func.func @transform_2(%arg0: i32, %arg1: i32, %arg2: i32) -> (i32, i32, i32) {
    %c0_i32 = arith.constant 0 : i32
    %c0_i32_0 = arith.constant 0 : i32
    %c0_i32_1 = arith.constant 0 : i32
    %c0_i32_2 = arith.constant 0 : i32
    return %c0_i32, %c0_i32_0, %c0_i32_1 : i32, i32, i32
  }
  func.func @transform_3(%arg0: i32, %arg1: i32, %arg2: i32) -> (i32, i32, i32) {
    %c0_i32 = arith.constant 0 : i32
    %c0_i32_0 = arith.constant 0 : i32
    return %arg0, %arg1, %c0_i32 : i32, i32, i32
  }
}

</mosaic_0001>

<bundles_post_ra>
// kernel: tpu_custom_call.1
= control target key start
LH: loop header
LB: loop body
LE: loop exit
PB: predicated region body
PF: predicated region fallthrough
CT: control target
= control target key end

     0   :  { %s1439_s0 = inlined_call_operand.hbm [shape: f32[2,4,8,8], index: 0, kind: input, shape index: {}]   ;;  %s1440_s1 = inlined_call_operand.hbm [shape: f32[2,8,32], index: 1, kind: input, shape index: {}]   ;;  %s1441_s2 = inlined_call_operand.hbm [shape: f32[4,32,32], index: 2, kind: input, shape index: {}]   ;;  %s1442_s3 = inlined_call_operand.hbm [shape: f32[2,8,32], index: 3, kind: output, shape index: {}]  }
   0x1   :  { %1452 = sst [smem:[#allocation16_spill]] %s1441_s2 }
   0x2   :  { %1453 = sst [smem:[#allocation17_spill]] %s1442_s3 }
   0x3   :  { %8 = vsyncpa [#allocation4], 0 }
   0x4   :  { %10 = vsyncpa [#allocation4 + $0x1], 0 }
   0x5   :  { %11 = vsyncpa [#allocation7], 0 }
   0x6   :  { %13 = vsyncpa [#allocation7 + $0x1], 0 }
   0x7   :  { %14 = vsyncpa [#allocation5], 0 }
   0x8   :  { %16 = vsyncpa [#allocation5 + $0x1], 0  ;;  %s1102_s12 = smov 0   ;;  %s1104_s13 = smov 0  }
   0x9   :  { %s1106_s14 = smov 0   ;;  %s1108_s15 = smov 0  }
   0xa   :  { %s1110_s16 = smov 0   ;;  %s1112_s17 = smov 0  }
   0xb   :  { %s1114_s18 = smov 0   ;;  %s1116_s19 = smov 0  }
   0xc   :  { %s1118_s20 = smov 0   ;;  %s1120_s21 = smov 0  }
   0xd   :  { %s1122_s22 = smov 0  }
   0xe LB: > { %s1158_s23 = sadd.s32 4294967295, %s1070_s22   ;;  %p664_p0 = scmp.ge.s32.totalorder %s1070_s22, 1  ;;  %s1070_s22 = sphi %s1122_s22, %s22_s22   ;;  %s1066_s21 = sphi %s1120_s21, %s1490_s21   ;;  %s1062_s20 = sphi %s1118_s20, %s1489_s20   ;;  %s1058_s19 = sphi %s1116_s19, %s1488_s19   ;;  %s1054_s18 = sphi %s1114_s18, %s1487_s18   ;;  %s1050_s17 = sphi %s1112_s17, %s1486_s17   ;;  %s1046_s16 = sphi %s1110_s16, %s1485_s16   ;;  %s1042_s15 = sphi %s1108_s15, %s1484_s15   ;;  %s1038_s14 = sphi %s1106_s14, %s1483_s14   ;;  %s1034_s13 = sphi %s1104_s13, %s1482_s13   ;;  %s1030_s12 = sphi %s1102_s12, %s1481_s12  }
   0xf   : > { %p1443_p1 = scmp.eq.s32.totalorder %s1158_s23, 0  ;;  %p149_p3 = scmp.lt.s32.totalorder %s1070_s22, 9 }
  0x10   : > { %s1072_s25 = smov [#allocation8]   ;;  %s1456_s2 = sld [smem:[#allocation16_spill]] }
  0x11   : > { %p1164_p4 = pnand %p664_p0, %p149_p3  ;;  %s161_s26 = sshll.u32 %s1072_s25, 4  ;;  %s162_s26 = int_to_ptr.vmem [resolvable:$true] %s161_s26 }
  0x13   : > { %s1454_s24 = scalar_select %p1164_p4, 1, 0 }
  0x14   : > { %p734_p5 = pneg %p1164_p4 }
  0x16   : > { %p1172_p6 = pnand %p734_p5, %p1443_p1  ;;  %s852_s30 = scalar_lea.hbm %s1456_s2, 2048 }
  0x17   : > { %p853_p7 = scmp.ne.s32.totalorder %s1456_s2, %s852_s30  ;;  %p859_p11 = scmp.lt.u32.totalorder %s852_s30, %s1456_s2 }
  0x18   : > { %p854_p8 = pneg %p1172_p6 }
  0x1a   : > { %p855_p9 = pnand %p854_p8, %p853_p7 }
  0x1c   : > { %p856_p10 = pneg %p855_p9 }
  0x1e   : > { %p861_p12 = pnand %p859_p11, %p856_p10 }
  0x20   : > { %864 = shalt.err (!%p861_p12)
}
  0x21   : > { %s865_s8 = scalar_lea.vmem %s162_s26, 2048  ;;  %p873_p5 = scmp.lt.s32.totalorder %s162_s26, %s162_s26 }
  0x22   : > { %p866_p13 = scmp.ne.s32.totalorder %s162_s26, %s865_s8  ;;  %p874_p2 = scmp.lt.s32.totalorder %s865_s8, %s865_s8 }
  0x24   : > { %p868_p0 = pnand %p866_p13, %p854_p8  ;;  %p875_p1 = por %p874_p2, %p873_p5 }
  0x26   : > { %p869_p3 = pneg %p868_p0 }
  0x28   : > { %p876_p4 = pnand %p875_p1, %p869_p3 }
  0x2a   : > { %879 = shalt.err (!%p876_p4)
}
  0x2b   : > { %s1073_s9 = smov 128   ;;  %s1074_s10 = smov 8  }
  0x2c   : > { %737 = dma.hbm_to_vmem [thread:$0]  (!%p1172_p6), %s1456_s2, 2048, %s162_s26, [#allocation7], %s1073_s9, %s1073_s9, %s1074_s10  }
  0x2d   : > { %s34_s28 = sadd.s32 1, %s1062_s20  ;;  %s41_s29 = sadd.s32 1, %s1066_s21 }
  0x2e   : > { %p35_p1 = scmp.ge.s32.totalorder %s34_s28, 4  ;;  %s50_s30 = sadd.s32 1, %s1050_s17 }
  0x2f   : > { %p57_p2 = scmp.ne.s32.totalorder %s1050_s17, %s1046_s16  ;;  %p1449_p4 = scmp.eq.s32.totalorder %s1070_s22, 0 }
  0x30   : > { %s1492_s28 = smov (%p35_p1, %s34_s28), 0  ;;  %s1494_s29 = smov (!%p35_p1, %s41_s29), %s1066_s21 }
  0x31   : > { %1457 = sst [smem:[#allocation14_spill]] %s1492_s28  ;;  %s46_s4 = ssub.s32 %s1062_s20, %s1492_s28 }
  0x32   : > { %p1205_p7 = por %p1449_p4, %p57_p2  ;;  %p43_p6 = scmp.ge.s32.totalorder %s1494_s29, 2 }
  0x33   : > { %p63_p8 = scmp.ne.s32.totalorder %s1046_s16, %s1042_s15  ;;  %p1448_p9 = scmp.lt.s32.totalorder %s1070_s22, 8 }
  0x34   : > { %s175_s26 = sand.u32 1, %s1050_s17   ;;  %s1496_s29 = smov (%p43_p6, %s1494_s29), 0 }
  0x35   : > { %1459 = sst [smem:[#allocation15_spill]] %s1496_s29  ;;  %p1460_p10 = scmp.eq.s32.totalorder %s1158_s23, 0 }
  0x36   : > { %s1223_s6 = ssub.s32 %s1066_s21, %s1496_s29  ;;  %s667_s7 = sshll.u32 %s175_s26, 3 }
  0x37   : > { %p1217_p11 = por %p1460_p10, %p63_p8  ;;  %s47_s8 = sor.u32 %s46_s4, %s1223_s6 }
  0x38   : > { %p48_p13 = scmp.eq.s32.totalorder %s47_s8, 0  ;;  %s668_s15 = sshll.u32 %s1066_s21, 2 }
  0x39   : > { %s179_s9 = scalar_lea.vmem [#allocation3], %s667_s7  ;;  %s184_s25 = sadd.s32 %s1062_s20, %s668_s15 }
  0x3a   : > { %s188_s10 = sshll.u32 %s179_s9, 4  ;;  %s669_s2 = sshll.u32 %s184_s25, 7  ;;  %s1232_s10 = int_to_ptr.vmem [resolvable:$true] %s188_s10 }
  0x3b   : > { %s1229_s11 = scalar_select %p48_p13, %s1050_s17, %s50_s30  }
  0x3c   : > { %p1238_p0 = pnand %p1448_p9, %p1205_p7  ;;  %s1245_s4 = scalar_lea.hbm %s1439_s0, %s669_s2 }
  0x3d   : > { %s176_s30 = scalar_lea.sflag [#allocation4], %s175_s26  ;;  %s880_s7 = scalar_lea.hbm %s1245_s4, 128 }
  0x3e   : > { %p881_p3 = scmp.ne.s32.totalorder %s1245_s4, %s880_s7  ;;  %p882_p5 = pneg %p1238_p0 }
  0x3f   : > { %s885_s3 = scalar_lea.hbm %s1439_s0, 1024  ;;  %p886_p7 = scmp.lt.u32.totalorder %s1245_s4, %s1439_s0 }
  0x40   : > { %p883_p1 = pnand %p882_p5, %p881_p3  ;;  %p887_p6 = scmp.lt.u32.totalorder %s885_s3, %s880_s7 }
  0x41   : > { %p889_p10 = scmp.lt.u32.totalorder %s880_s7, %s1245_s4 }
  0x42   : > { %p884_p2 = pneg %p883_p1  ;;  %p888_p8 = por %p887_p6, %p886_p7 }
  0x44   : > { %p890_p13 = por %p889_p10, %p888_p8 }
  0x46   : > { %p891_p9 = pnand %p890_p13, %p884_p2 }
  0x48   : > { %894 = shalt.err (!%p891_p9)
}
  0x49   : > { %s895_s26 = scalar_lea.vmem %s1232_s10, 128  ;;  %s1075_s15 = smov [#allocation3]  }
  0x4a   : > { %p896_p3 = scmp.ne.s32.totalorder %s1232_s10, %s895_s26  ;;  %s900_s9 = sshll.u32 %s1075_s15, 4  ;;  %s901_s9 = int_to_ptr.vmem [resolvable:$false] %s900_s9 }
  0x4b   : > { %s902_s25 = scalar_lea.vmem %s901_s9, 256  ;;  %p903_p12 = scmp.lt.s32.totalorder %s1232_s10, %s901_s9 }
  0x4c   : > { %p898_p1 = pnand %p896_p3, %p882_p5  ;;  %p904_p7 = scmp.lt.s32.totalorder %s902_s25, %s895_s26 }
  0x4e   : > { %p899_p4 = pneg %p898_p1  ;;  %p905_p6 = por %p904_p7, %p903_p12 }
  0x50   : > { %p906_p8 = pnand %p905_p6, %p899_p4 }
  0x52   : > { %909 = shalt.err (!%p906_p8)
}
  0x53   : > { %741 = dma.hbm_to_vmem [thread:$0]  (!%p1238_p0), %s1245_s4, 128, %s1232_s10, %s176_s30  }
  0x54   : > { %s663_s7 = sadd.s32 4294967294, %s1070_s22   ;;  %s76_s27 = sadd.s32 1, %s1038_s14 }
  0x55   : > { %p1463_p4 = scmp.eq.s32.totalorder %s1223_s6, 0  ;;  %p83_p9 = scmp.ne.s32.totalorder %s1038_s14, %s1034_s13 }
  0x56   : > { %p89_p12 = scmp.ne.s32.totalorder %s1034_s13, %s1030_s12  ;;  %p142_p5 = scmp.eq.s32.totalorder %s663_s7, 7 }
  0x57   : > { %s1277_s29 = scalar_select %p1463_p4, %s1038_s14, %s76_s27  }
  0x58   : > { %s195_s8 = sand.u32 1, %s1070_s22   ;;  %p1464_p2 = scmp.eq.s32.totalorder %s1070_s22, 0 }
  0x59   : > { %p1465_p13 = scmp.eq.s32.totalorder %s1158_s23, 0  ;;  %p1467_p1 = scmp.eq.s32.totalorder %s1158_s23, 7 }
  0x5a   : > { %p85_p10 = por %p83_p9, %p1464_p2  ;;  %p1298_p0 = por %p142_p5, %p89_p12 }
  0x5b   : > { %p1288_p3 = por %p89_p12, %p1465_p13  ;;  %p1294_p7 = por %p1467_p1, %p83_p9 }
  0x5c   : > { %s1469_s6 = scalar_select %p1298_p0, 1, 0 }
  0x5d   : > { %s1466_s3 = scalar_select %p1288_p3, 1, 0 }
  0x5e   : > { %s1468_s10 = scalar_select %p1294_p7, 1, 0 }
  0x5f   : > { %s197_s4 = sand.u32 1, %s1038_s14   ;;  %s671_s28 = sshll.u32 %s1066_s21, 7 }
  0x60   : > { %s670_s30 = sshll.u32 %s197_s4, 3  ;;  %s1307_s15 = scalar_lea.hbm %s1440_s1, %s671_s28 }
  0x61   : > { %s199_s9 = scalar_lea.vmem [#allocation6], %s670_s30  ;;  %p1470_p6 = scmp.lt.s32.totalorder %s1070_s22, 8 }
  0x62   : > { %s206_s25 = sshll.u32 %s199_s9, 4  ;;  %s196_s27 = scalar_lea.sflag [#allocation7], %s195_s8  ;;  %s1315_s25 = int_to_ptr.vmem [resolvable:$true] %s206_s25 }
  0x63   : > { %p1311_p8 = pnand %p1470_p6, %p85_p10  ;;  %s910_s4 = scalar_lea.hbm %s1307_s15, 128 }
  0x64   : > { %p911_p4 = scmp.ne.s32.totalorder %s1307_s15, %s910_s4  ;;  %s915_s2 = scalar_lea.hbm %s1440_s1, 256 }
  0x65   : > { %p912_p9 = pneg %p1311_p8  ;;  %p916_p2 = scmp.lt.u32.totalorder %s1307_s15, %s1440_s1 }
  0x66   : > { %p917_p10 = scmp.lt.u32.totalorder %s915_s2, %s910_s4  ;;  %p919_p1 = scmp.lt.u32.totalorder %s910_s4, %s1307_s15 }
  0x67   : > { %p913_p12 = pnand %p912_p9, %p911_p4 }
  0x68   : > { %p918_p13 = por %p917_p10, %p916_p2 }
  0x69   : > { %p914_p5 = pneg %p913_p12 }
  0x6a   : > { %p920_p6 = por %p919_p1, %p918_p13 }
  0x6c   : > { %p921_p0 = pnand %p920_p6, %p914_p5 }
  0x6e   : > { %924 = shalt.err (!%p921_p0)
}
  0x6f   : > { %s925_s8 = scalar_lea.vmem %s1315_s25, 128  ;;  %s1076_s30 = smov [#allocation6]  }
  0x70   : > { %p926_p4 = scmp.ne.s32.totalorder %s1315_s25, %s925_s8  ;;  %s930_s28 = sshll.u32 %s1076_s30, 4  ;;  %s931_s28 = int_to_ptr.vmem [resolvable:$false] %s930_s28 }
  0x71   : > { %s932_s26 = scalar_lea.vmem %s931_s28, 256  ;;  %p933_p3 = scmp.lt.s32.totalorder %s1315_s25, %s931_s28 }
  0x72   : > { %p928_p12 = pnand %p926_p4, %p912_p9  ;;  %p934_p2 = scmp.lt.s32.totalorder %s932_s26, %s925_s8 }
  0x74   : > { %p929_p7 = pneg %p928_p12  ;;  %p935_p10 = por %p934_p2, %p933_p3 }
  0x76   : > { %p936_p13 = pnand %p935_p10, %p929_p7 }
  0x78   : > { %939 = shalt.err (!%p936_p13)
}
  0x79   : > { %744 = dma.hbm_to_vmem [thread:$0]  (!%p1311_p8), %s1307_s15, 128, %s1315_s25, %s196_s27  }
  0x7a   : > { %p1472_p0 = scmp.ne.s32.totalorder %s1454_s24, 0 }
  0x7b   : > { %s217_s4 = sand.u32 (!%p1472_p0), 1, %s1046_s16  }
  0x7c   : > { %215 = sbr.rel (%p1472_p0) target bundleno = 987 (0x3db), region = 32  ;;  %s673_s2 = sshll.u32 (!%p1472_p0), %s217_s4, 3 }
  0x7d   : > { %s218_s9 = scalar_lea.sflag (!%p1472_p0), [#allocation4], %s217_s4  ;;  %s221_s30 = scalar_lea.vmem (!%p1472_p0), [#allocation3], %s673_s2 }
  0x83   : > { %1013 = dma.done.wait (%p1217_p11), %s218_s9, 128  }
  0x84   : > { %1015 = vsyncadd (%p1217_p11), %s218_s9, 4294967168  ;;  %s226_s7 = sand.u32 1, %s1158_s23   ;;  %s228_s15 = sand.u32 1, %s1034_s13  }
  0x85   : > { %s1353_s24 = sshll.u32 %s228_s15, 3  ;;  %s227_s25 = scalar_lea.sflag [#allocation7], %s226_s7 }
  0x86   : > { %s230_s27 = scalar_lea.vmem [#allocation6], %s1353_s24  ;;  %p1473_p3 = scmp.ne.s32.totalorder %s1466_s3, 0 }
  0x88   : > { %1017 = dma.done.wait (%p1473_p3), %s227_s25, 128  }
  0x89   : > { %1019 = vsyncadd (%p1473_p3), %s227_s25, 4294967168  ;;  %p1474_p7 = scmp.eq.s32.totalorder %s1158_s23, 0 }
  0x8b   : > { %1021 = dma.done.wait (%p1474_p7), [#allocation7], 2048   ;;  %p1475_p11 = pmov %p1474_p7 }
  0x8c   : > { %s261_s5 = scalar_lea.vmem [#allocation9], %s1353_s24  ;;  %p677_p8 = scmp.ne.s32.totalorder %s1054_s18, 0 }
  0x8d   : > { %1023 = vsyncadd (%p1475_p11), [#allocation7], 4294965248  ;;  %vm266_vm0 = vcmask (!%p677_p8), 261120   ;;  %v1077_v0 = vmov (!%p677_p8), 0.0  }
  0x8e   : > { %265 = sbr.rel (%p677_p8) target bundleno = 149 (0x95), region = 48  ;;  %267 = vst.msk [vmem:[#allocation2] sm:$0xff] (!%p677_p8), %vm266_vm0, %v1077_v0 }
  0x95 PF: > { %v271_v1 = vld [vmem:[%s221_s30] sm:$0xff]  ;;  %vm280_vm1 = vcmask 64512   ;;  %v1078_v2 = vmov 0.0   ;;  %vm1079_vm2 = vmmov 0   ;;  %v272_v7 = vld [vmem:[%s230_s27] sm:$0xff]  ;;  %s678_s23 = sshll.u32 %s1054_s18, 5 }
  0x96   : > { %697 = vmatprep.subr.mxu0 %v1078_v2  ;;  %699 = vmatprep.mubr.msk.f32.mxu0 %vm1079_vm2, %v1078_v2  ;;  %v279_v3 = vmul.f32 0.35355338, %v271_v1  ;;  %v1080_v13 = vmov 0.0|0.0   ;;  %s274_s3 = scalar_lea.vmem [#allocation8], %s678_s23  ;;  %vm442_vm3 = vcmask 261120   ;;  %v441_v25 = vld [vmem:[#allocation2] sm:$0xff] }
  0x97   : > { %698 = vmatpush3.xpose.msk.msra.mxu0 %vm280_vm1, %v271_v1  ;;  %715 = vmatprep.mubr.msk.f32.mxu1 %vm1079_vm2, %v1078_v2  ;;  %v275_v14 = vld [vmem:[%s274_s3] sm:$0xff]  ;;  %v276_v15 = vld [vmem:[%s274_s3 + $0x8] sm:$0xff]  ;;  %v277_v17 = vld [vmem:[%s274_s3 + $0x10] sm:$0xff]  ;;  %p683_p9 = scmp.ne.s32.totalorder %s1054_s18, 3 }
  0x98   : > { %702 = vmatprep.subr.mxu0 %v1078_v2  ;;  %718 = vmatprep.subr.bf16.mxu1 %v1080_v13  ;;  %v719_v16 = vpack.c.bf16 %v276_v15, %v275_v14  ;;  %v278_v18 = vld [vmem:[%s274_s3 + $0x18] sm:$0xff] }
  0x99   : > { %v722_v19 = vpack.c.bf16 %v278_v18, %v277_v17 }
  0x9a   : > { %700 = vmatmul.mubr.msk.f32.vlgmr.msra.gmra.mrb[0].mxu0 %vm280_vm1, %v279_v3  ;;  %720 = vmatpush3.bf16.msra.mxu1 %v719_v16 }
  0x9b   : > { %704 = vmatprep.mubr.msk.f32.mxu0 %vm1079_vm2, %v1078_v2  ;;  %703 = vmatpush3.msra.mxu0 %v272_v7 }
  0x9c   : > { %721 = vmatprep.subr.bf16.mxu1 %v1080_v13 }
  0x9e   : > { %723 = vmatpush3.bf16.msra.mxu1 %v722_v19 }
 0x16d   : > { %v353_v4 = vpop.f32.mrb[0].mxu0 }
 0x16e   : > { %v701_v5 = vpop.f32.mrb[1].mxu0  ;;  %v357_v6 = vsel %vm280_vm1, %v353_v4, -inf }
 0x16f   : > { %358 = vmax.xlane.f32.xlu0 %v357_v6 }
 0x1fc   : > { %v359_v8 = vpop.xlane.xlu0 %358 }
 0x1fd   : > { %v360_v9 = vsub.f32 %v353_v4, %v359_v8 }
 0x1ff   : > { %v361_v10 = vmul.f32 1.442695, %v360_v9 }
 0x201   : > { %848 = vpow2.f32 %v361_v10 }
 0x20b   : > { %v849_v11 = vpop.eup %848 }
 0x20c   : > { %705 = vmatmul.mubr.msk.f32.vlgmr.msra.gmra.mrb[2].mxu0 %vm280_vm1, %v849_v11  ;;  %v363_v12 = vsel %vm280_vm1, %v849_v11, 0.0 }
 0x20d   : > { %364 = vadd.xlane.f32.xlu0 %v363_v12 }
 0x29a   : > { %v365_v20 = vpop.xlane.xlu0 %364 }
 0x29b   : > { %850 = vrcp.f32 %v365_v20 }
 0x2a5   : > { %v851_v21 = vpop.eup %850 }
 0x2df   : > { %v435_v22 = vpop.f32.mrb[2].mxu0 }
 0x2e0   : > { %v440_v23 = vmul.f32 %v851_v21, %v435_v22  ;;  %v706_v24 = vpop.f32.mrb[3].mxu0 }
 0x2e2   : > { %716 = vmatmul.mubr.msk.f32.vlgmr.msra.gmra.mrb[0].mxu1 %vm442_vm3, %v440_v23 }
 0x3b2   : > { %521 = sbr.rel (%p683_p9) target bundleno = 961 (0x3c1), region = 52 }
 0x3b5   : > { %v512_v26 = vpop.f32.mrb[0].mxu1 }
 0x3b6   : > { %v516_v27 = vadd.f32 %v512_v26, %v441_v25  ;;  %v717_v28 = vpop.f32.mrb[1].mxu1 }
 0x3b8   : > { %517 = vst.msk [vmem:[#allocation2] sm:$0xff] %vm442_vm3, %v516_v27 }
 0x3bf   : > { %v522_v29 = vld [vmem:[#allocation2] sm:$0xff] }
 0x3c0   : > { %523 = vst.msk [vmem:[%s261_s5] sm:$0xff] %vm442_vm3, %v522_v29 }
 0x3c1 PF: > { %s685_s8 = sshll.u32 %s1058_s19, 7  ;;  %s1476_s4 = sld [smem:[#allocation17_spill]] }
 0x3c2   : > { %s539_s9 = sshll.u32 %s261_s5, 4  ;;  %s525_s18 = scalar_lea.sflag [#allocation5], %s228_s15  ;;  %s540_s9 = int_to_ptr.vmem [resolvable:$true] %s539_s9 }
 0x3c3   : > { %s940_s30 = scalar_lea.vmem %s540_s9, 128  ;;  %p1477_p1 = scmp.ne.s32.totalorder %s1468_s10, 0 }
 0x3c4   : > { %p941_p5 = scmp.ne.s32.totalorder %s540_s9, %s940_s30  ;;  %s1081_s7 = smov [#allocation9]  }
 0x3c5   : > { %s944_s25 = sshll.u32 %s1081_s7, 4  ;;  %s945_s25 = int_to_ptr.vmem [resolvable:$false] %s944_s25 }
 0x3c6   : > { %p942_p6 = pnand %p941_p5, %p1477_p1  ;;  %s946_s27 = scalar_lea.vmem %s945_s25, 256 }
 0x3c7   : > { %s1379_s2 = scalar_lea.hbm %s1476_s4, %s685_s8  ;;  %p947_p12 = scmp.lt.s32.totalorder %s540_s9, %s945_s25 }
 0x3c8   : > { %p943_p4 = pneg %p942_p6  ;;  %p948_p2 = scmp.lt.s32.totalorder %s946_s27, %s940_s30 }
 0x3ca   : > { %p949_p10 = por %p948_p2, %p947_p12 }
 0x3cc   : > { %p950_p13 = pnand %p949_p10, %p943_p4 }
 0x3ce   : > { %953 = shalt.err (!%p950_p13)
}
 0x3cf   : > { %s954_s19 = scalar_lea.hbm %s1379_s2, 128  ;;  %s958_s5 = scalar_lea.hbm %s1476_s4, 256 }
 0x3d0   : > { %p955_p0 = scmp.ne.s32.totalorder %s1379_s2, %s954_s19  ;;  %p959_p11 = scmp.lt.u32.totalorder %s1379_s2, %s1476_s4 }
 0x3d1   : > { %p960_p8 = scmp.lt.u32.totalorder %s958_s5, %s954_s19  ;;  %p962_p5 = scmp.lt.u32.totalorder %s954_s19, %s1379_s2 }
 0x3d2   : > { %p956_p3 = pnand %p955_p0, %p1477_p1 }
 0x3d3   : > { %p961_p9 = por %p960_p8, %p959_p11 }
 0x3d4   : > { %p957_p7 = pneg %p956_p3 }
 0x3d5   : > { %p963_p6 = por %p962_p5, %p961_p9 }
 0x3d7   : > { %p964_p4 = pnand %p963_p6, %p957_p7 }
 0x3d9   : > { %967 = shalt.err (!%p964_p4)
}
 0x3da   : > { %732 = dma.vmem_to_hbm [thread:$0]  (%p1477_p1), %s540_s9, 128, %s1379_s2, %s525_s18  }
 0x3db PF: > { %p752_p12 = scmp.ge.s32.totalorder %s1070_s22, 2  ;;  %s551_s8 = sand.u32 1, %s1030_s12  }
 0x3dc   : > { %p1478_p2 = scmp.ne.s32.totalorder %s1469_s6, 0  ;;  %s552_s28 = scalar_lea.sflag [#allocation5], %s551_s8 }
 0x3de   : > { %p746_p10 = pnand %p752_p12, %p1478_p2 }
 0x3e0   : > { %1025 = dma.done.wait (!%p746_p10), %s552_s28, 128  }
 0x3e1   : > { %1027 = vsyncadd (!%p746_p10), %s552_s28, 4294967168  ;;  %s22_s22 = sadd.s32 1, %s1070_s22   ;;  %s1479_s10 = sld [smem:[#allocation14_spill]] }
 0x3e2   : > { %p19_p13 = scmp.ge.s32.totalorder %s22_s22, 10   ;;  %s1480_s26 = sld [smem:[#allocation15_spill]] }
 0x3e3   : > { %s1481_s12 = smov %s1034_s13  ;;  %s1482_s13 = smov %s1038_s14 }
 0x3e4   : > { %s1483_s14 = smov %s1277_s29  ;;  %s1484_s15 = smov %s1046_s16 }
 0x3e5   : > { %s1485_s16 = smov %s1050_s17  ;;  %s1486_s17 = smov %s1229_s11 }
 0x3e6   : > { %s1487_s18 = smov %s1062_s20  ;;  %s1488_s19 = smov %s1066_s21 }
 0x3e7   : > { %s1489_s20 = smov %s1479_s10  ;;  %21 = sbr.rel (!%p19_p13) target bundleno = 14 (0xe), region = 104 }
 0x3e8   : > { %s1490_s21 = smov %s1480_s26 }
 0x3ee   :  { %557 = vsyncpa [#allocation4], 1 }
 0x3ef   :  { %559 = vsyncpa [#allocation4 + $0x1], 1 }
 0x3f0   :  { %560 = vsyncpa [#allocation7], 1 }
 0x3f1   :  { %562 = vsyncpa [#allocation7 + $0x1], 1 }
 0x3f2   :  { %563 = vsyncpa [#allocation5], 1 }
 0x3f3   :  { %565 = vsyncpa [#allocation5 + $0x1], 1 }

</bundles_post_ra>
